<compile_context>
chip_gen: v5e
topology: v5e:2x2
jax: 0.10.0
libtpu: 0.0.40
codegen_flags: <defaults>
</compile_context>

<pallas_src>
import functools

import jax
import jax.numpy as jnp
from jax.experimental import pallas as pl
from jax.experimental.pallas import tpu as pltpu


def gcn_fused_kernel(a_ref, x_ref, w1_ref, w2p_ref, out_ref, *, num_classes):
    """Fused GCN forward for one graph of the batch (one grid step).

    a_ref:   [N, N]      normalized adjacency (resident across grid steps)
    x_ref:   [N, F]      node features of graph `b` (batch dim squeezed)
    w1_ref:  [F, E]      conv1 weight        (resident across grid steps)
    w2p_ref: [E, Cpad]   conv2 weight, class dim zero-padded to 128 lanes
    out_ref: [N, Cpad]   lane-dense log-softmax scores (padded cols = 0)
    """
    a = a_ref[...]
    x = x_ref[...]

    # conv1: (A @ X) @ W1 — this order keeps the N^2 matmul at width F (< E).
    # (For large N on v6e/v7x, cast a/x/h to bf16 here and keep
    #  preferred_element_type=f32; left in f32 at these tiny shapes.)
    ax = jnp.dot(a, x, preferred_element_type=jnp.float32)
    h = jnp.maximum(
        jnp.dot(ax, w1_ref[...], preferred_element_type=jnp.float32), 0.0
    )

    # conv2 reassociated: A @ (H @ W2) — mathematically identical, but the
    # N^2-scaling matmul accumulates over the (padded) class width, not E.
    hw2 = jnp.dot(h, w2p_ref[...], preferred_element_type=jnp.float32)  # [N, Cpad]
    z = jnp.dot(a, hw2, preferred_element_type=jnp.float32)             # [N, Cpad]

    # Numerically-stable log-softmax over the REAL classes only; padded lanes
    # are masked to -inf so they contribute nothing to max / sum.
    col = jax.lax.broadcasted_iota(jnp.int32, z.shape, 1)
    valid = col < num_classes
    z = jnp.where(valid, z, -jnp.inf)
    m = jnp.max(z, axis=1, keepdims=True)
    shifted = z - m
    lse = jnp.log(jnp.sum(jnp.exp(shifted), axis=1, keepdims=True))
    log_probs = shifted - lse
    # Write zeros into the padded lanes (they are sliced off in the wrapper);
    # full 128-lane store -> unmasked vst.
    out_ref[...] = jnp.where(valid, log_probs, 0.0).astype(out_ref.dtype)


def custom_gcn_forward(adj, x_batch, w1, w2):
    """Batched Pallas wrapper.

    adj:     [N, N]      shared normalized adjacency
    x_batch: [B, N, F]   batch of node-feature matrices (one graph each)
    w1:      [F, E]
    w2:      [E, C]
    returns  [B, N, C]   log-softmax class scores
    """
    n, _ = adj.shape
    b, n2, f = x_batch.shape
    assert n2 == n
    e, c = w2.shape
    c_pad = 128  # lane-dense output / weight width

    # Zero-pad conv2 weight along the class dim so the whole second half of
    # the kernel (matmuls + store) is 128-lane dense.
    w2p = jnp.pad(w2, ((0, 0), (0, c_pad - c)))

    itemsize = 4  # f32
    flops_per_graph = 2 * (n * n * f + n * f * e + n * e * c_pad + n * n * c_pad)
    cost = pl.CostEstimate(
        flops=b * flops_per_graph,
        transcendentals=b * n * (c_pad + 1),  # exp per lane + log per row
        bytes_accessed=itemsize
        * (n * n + b * n * f + f * e + e * c_pad + b * n * c_pad),
    )

    kernel = functools.partial(gcn_fused_kernel, num_classes=c)

    out_padded = pl.pallas_call(
        kernel,
        out_shape=jax.ShapeDtypeStruct((b, n, c_pad), jnp.float32),
        grid=(b,),
        in_specs=[
            # Adjacency and weights: constant block index -> DMA'd once,
            # resident in VMEM for the whole batch.
            pl.BlockSpec((n, n), lambda bi: (0, 0)),            # adj
            pl.BlockSpec((None, n, f), lambda bi: (bi, 0, 0)),  # x (per-graph)
            pl.BlockSpec((f, e), lambda bi: (0, 0)),            # w1
            pl.BlockSpec((e, c_pad), lambda bi: (0, 0)),        # w2 (padded)
        ],
        out_specs=pl.BlockSpec((None, n, c_pad), lambda bi: (bi, 0, 0)),
        compiler_params=pltpu.CompilerParams(
            dimension_semantics=("parallel",),  # shards batch across TCs on v7x
        ),
        cost_estimate=cost,
    )(adj, x_batch, w1, w2p)

    # Slice the lane padding back off.
    return out_padded[..., :c]


def reference_forward(adj, x_batch, w1, w2):
    """Pure-JAX reference of the PyTorch forward (vmapped over the batch)."""

    def one(xg):
        h = jnp.maximum(adj @ xg @ w1, 0.0)
        z = adj @ h @ w2
        return jax.nn.log_softmax(z, axis=1)

    return jax.vmap(one)(x_batch)


if __name__ == "__main__":
    # Small, module-consistent shapes; a batch of graphs sharing A / weights.
    batch = 8
    num_nodes = 16
    feat_dim = 8
    embed_dim = 32
    num_classes = 4

    key = jax.random.PRNGKey(0)
    k_adj, k_x, k_w1, k_w2, k_lin = jax.random.split(key, 5)

    # Deterministic symmetric-normalized adjacency A_hat = D^-1/2 (A+I) D^-1/2
    raw = (jax.random.uniform(k_adj, (num_nodes, num_nodes)) > 0.7).astype(jnp.float32)
    a_sym = jnp.maximum(raw, raw.T) + jnp.eye(num_nodes, dtype=jnp.float32)
    deg = jnp.sum(a_sym, axis=1)
    d_inv_sqrt = 1.0 / jnp.sqrt(deg)
    adj = a_sym * d_inv_sqrt[:, None] * d_inv_sqrt[None, :]

    # Batched node features and layer weights (deterministic init).
    x_batch = jax.random.normal(k_x, (batch, num_nodes, feat_dim), dtype=jnp.float32)
    w1 = jax.random.normal(k_w1, (feat_dim, embed_dim), dtype=jnp.float32) * 0.1
    w2 = jax.random.normal(k_w2, (embed_dim, num_classes), dtype=jnp.float32) * 0.1
    # Unused-in-forward linear layer (created for module parity only).
    _linear_w = (
        jax.random.normal(k_lin, (num_classes, embed_dim), dtype=jnp.float32) * 0.1
    )

    out = custom_gcn_forward(adj, x_batch, w1, w2)
    out = jax.block_until_ready(out)

    ref = reference_forward(adj, x_batch, w1, w2)
    assert out.shape == (batch, num_nodes, num_classes)
    assert jnp.allclose(out, ref, atol=1e-5, rtol=1e-5), "mismatch vs reference"

    print("KERNEL_OK")
</pallas_src>

<mosaic_0001>
module attributes {stable_mosaic.version = 11 : i64} {
  func.func @gcn_fused_kernel(%arg0: i32, %arg1: memref<16x16xf32, #tpu.memory_space<vmem>>, %arg2: memref<1x16x8xf32, #tpu.memory_space<vmem>>, %arg3: memref<8x32xf32, #tpu.memory_space<vmem>>, %arg4: memref<32x128xf32, #tpu.memory_space<vmem>>, %arg5: memref<1x16x128xf32, #tpu.memory_space<vmem>>) attributes {dimension_semantics = [#tpu.dimension_semantics<parallel>], iteration_bounds = array<i64: 8>, scalar_prefetch = 0 : i64, scratch_operands = 0 : i64, tpu.core_type = #tpu.core_type<tc>, window_params = [{pipeline_mode = #tpu.pipeline_mode<synchronous>, transform_indices = @transform_0, window_bounds = array<i64: 16, 16>}, {transform_indices = @transform_1, window_bounds = array<i64: 1, 16, 8>}, {pipeline_mode = #tpu.pipeline_mode<synchronous>, transform_indices = @transform_2, window_bounds = array<i64: 8, 32>}, {pipeline_mode = #tpu.pipeline_mode<synchronous>, transform_indices = @transform_3, window_bounds = array<i64: 32, 128>}, {transform_indices = @transform_4, window_bounds = array<i64: 1, 16, 128>}]} {
    %c0 = arith.constant 0 : index
    %c0_0 = arith.constant 0 : index
    %0 = vector.load %arg1[%c0, %c0_0] : memref<16x16xf32, #tpu.memory_space<vmem>>, vector<16x16xf32>
    %c0_1 = arith.constant 0 : index
    %c0_2 = arith.constant 0 : index
    %c0_3 = arith.constant 0 : index
    %1 = vector.load %arg2[%c0_1, %c0_2, %c0_3] : memref<1x16x8xf32, #tpu.memory_space<vmem>>, vector<1x16x8xf32>
    %2 = vector.shape_cast %1 : vector<1x16x8xf32> to vector<16x8xf32>
    %cst = arith.constant dense<0.000000e+00> : vector<16x8xf32>
    %3 = tpu.matmul %0, %2, %cst {dimension_numbers = #tpu.dot_dimension_numbers<[1], [0], [0], [1], [0, 0, 1, 1], [], []>} : vector<16x16xf32>, vector<16x8xf32>, vector<16x8xf32> -> vector<16x8xf32>
    %c0_4 = arith.constant 0 : index
    %c0_5 = arith.constant 0 : index
    %4 = vector.load %arg3[%c0_4, %c0_5] : memref<8x32xf32, #tpu.memory_space<vmem>>, vector<8x32xf32>
    %cst_6 = arith.constant dense<0.000000e+00> : vector<16x32xf32>
    %5 = tpu.matmul %3, %4, %cst_6 {dimension_numbers = #tpu.dot_dimension_numbers<[1], [0], [0], [1], [0, 0, 1, 1], [], []>} : vector<16x8xf32>, vector<8x32xf32>, vector<16x32xf32> -> vector<16x32xf32>
    %cst_7 = arith.constant 0.000000e+00 : f32
    %6 = vector.broadcast %cst_7 : f32 to vector<16x32xf32>
    %7 = arith.maximumf %5, %6 : vector<16x32xf32>
    %c0_8 = arith.constant 0 : index
    %c0_9 = arith.constant 0 : index
    %8 = vector.load %arg4[%c0_8, %c0_9] : memref<32x128xf32, #tpu.memory_space<vmem>>, vector<32x128xf32>
    %cst_10 = arith.constant dense<0.000000e+00> : vector<16x128xf32>
    %9 = tpu.matmul %7, %8, %cst_10 {dimension_numbers = #tpu.dot_dimension_numbers<[1], [0], [0], [1], [0, 0, 1, 1], [], []>} : vector<16x32xf32>, vector<32x128xf32>, vector<16x128xf32> -> vector<16x128xf32>
    %cst_11 = arith.constant dense<0.000000e+00> : vector<16x128xf32>
    %10 = tpu.matmul %0, %9, %cst_11 {dimension_numbers = #tpu.dot_dimension_numbers<[1], [0], [0], [1], [0, 0, 1, 1], [], []>} : vector<16x16xf32>, vector<16x128xf32>, vector<16x128xf32> -> vector<16x128xf32>
    %11 = tpu.iota {dimensions = array<i32: 1>} : vector<16x128xi32>
    %c4_i32 = arith.constant 4 : i32
    %12 = vector.broadcast %c4_i32 : i32 to vector<16x128xi32>
    %13 = arith.cmpi slt, %11, %12 : vector<16x128xi32>
    %cst_12 = arith.constant 0xFF800000 : f32
    %14 = vector.broadcast %cst_12 : f32 to vector<16x128xf32>
    %15 = arith.select %13, %10, %14 : vector<16x128xi1>, vector<16x128xf32>
    %cst_13 = arith.constant dense<0xFF800000> : vector<16xf32>
    %16 = vector.multi_reduction <maximumf>, %15, %cst_13 [1] : vector<16x128xf32> to vector<16xf32>
    %17 = vector.shape_cast %16 : vector<16xf32> to vector<16x1xf32>
    %18 = vector.broadcast %17 : vector<16x1xf32> to vector<16x128xf32>
    %19 = arith.subf %15, %18 : vector<16x128xf32>
    %20 = math.exp %19 : vector<16x128xf32>
    %cst_14 = arith.constant dense<0.000000e+00> : vector<16xf32>
    %21 = vector.multi_reduction <add>, %20, %cst_14 [1] : vector<16x128xf32> to vector<16xf32>
    %22 = vector.shape_cast %21 : vector<16xf32> to vector<16x1xf32>
    %23 = math.log %22 : vector<16x1xf32>
    %24 = vector.broadcast %23 : vector<16x1xf32> to vector<16x128xf32>
    %25 = arith.subf %19, %24 : vector<16x128xf32>
    %cst_15 = arith.constant 0.000000e+00 : f32
    %26 = vector.broadcast %cst_15 : f32 to vector<16x128xf32>
    %27 = arith.select %13, %25, %26 : vector<16x128xi1>, vector<16x128xf32>
    %c0_16 = arith.constant 0 : index
    %c0_17 = arith.constant 0 : index
    %c0_18 = arith.constant 0 : index
    %28 = vector.load %arg5[%c0_16, %c0_17, %c0_18] : memref<1x16x128xf32, #tpu.memory_space<vmem>>, vector<1x16x128xf32>
    %29 = vector.shape_cast %28 : vector<1x16x128xf32> to vector<16x128xf32>
    %30 = vector.shape_cast %27 : vector<16x128xf32> to vector<1x16x128xf32>
    tpu.vector_store %arg5[%c0_16, %c0_17, %c0_18], %30 {strides = array<i32>} : memref<1x16x128xf32, #tpu.memory_space<vmem>>, vector<1x16x128xf32>,
    return
  }
  func.func @transform_0(%arg0: i32) -> (i32, i32) {
    %c0_i32 = arith.constant 0 : i32
    %c0_i32_0 = arith.constant 0 : i32
    %c0_i32_1 = arith.constant 0 : i32
    return %c0_i32, %c0_i32_0 : i32, i32
  }
  func.func @transform_1(%arg0: i32) -> (i32, i32, i32) {
    %c0_i32 = arith.constant 0 : i32
    %c0_i32_0 = arith.constant 0 : i32
    %c0_i32_1 = arith.constant 0 : i32
    return %arg0, %c0_i32, %c0_i32_0 : i32, i32, i32
  }
  func.func @transform_2(%arg0: i32) -> (i32, i32) {
    %c0_i32 = arith.constant 0 : i32
    %c0_i32_0 = arith.constant 0 : i32
    %c0_i32_1 = arith.constant 0 : i32
    return %c0_i32, %c0_i32_0 : i32, i32
  }
  func.func @transform_3(%arg0: i32) -> (i32, i32) {
    %c0_i32 = arith.constant 0 : i32
    %c0_i32_0 = arith.constant 0 : i32
    %c0_i32_1 = arith.constant 0 : i32
    return %c0_i32, %c0_i32_0 : i32, i32
  }
  func.func @transform_4(%arg0: i32) -> (i32, i32, i32) {
    %c0_i32 = arith.constant 0 : i32
    %c0_i32_0 = arith.constant 0 : i32
    %c0_i32_1 = arith.constant 0 : i32
    return %arg0, %c0_i32, %c0_i32_0 : i32, i32, i32
  }
}

</mosaic_0001>

<bundles_post_ra>
// kernel: tpu_custom_call.1
= control target key start
LH: loop header
LB: loop body
LE: loop exit
PB: predicated region body
PF: predicated region fallthrough
CT: control target
= control target key end

     0   :  { %9 = vsyncpa [#allocation3], 0  ;;  %s703_s0 = inlined_call_operand.vmem [shape: f32[16,16], index: 0, kind: input, shape index: {}]   ;;  %s704_s1 = inlined_call_operand.vmem [shape: f32[8,16,8], index: 1, kind: input, shape index: {}]   ;;  %s705_s2 = inlined_call_operand.vmem [shape: f32[8,32], index: 2, kind: input, shape index: {}]   ;;  %s706_s3 = inlined_call_operand.vmem [shape: f32[32,128], index: 3, kind: input, shape index: {}]   ;;  %s707_s4 = inlined_call_operand.hbm [shape: f32[8,16,128], index: 4, kind: output, shape index: {}]  }
   0x1   :  { %11 = vsyncpa [#allocation3 + $0x1], 0  ;;  %s589_s15 = smov 0   ;;  %s591_s16 = smov 0  }
   0x2   :  { %s593_s17 = smov 0   ;;  %s595_s18 = smov 0  }
   0x3 LB: > { %s610_s19 = sadd.s32 4294967295, %s560_s18   ;;  %s427_s20 = sadd.s32 4294967294, %s560_s18   ;;  %s560_s18 = sphi %s595_s18, %s713_s18   ;;  %s556_s17 = sphi %s593_s17, %s712_s17   ;;  %s552_s16 = sphi %s591_s16, %s711_s16   ;;  %s548_s15 = sphi %s589_s15, %s710_s15  }
   0x4   : > { %s614_s21 = sadd.s32 1, %s560_s18   ;;  %s113_s22 = sadd.s32 1, %s556_s17 }
   0x5   : > { %s110_s23 = ssub.s32 %s560_s18, %s614_s21  ;;  %p123_p0 = scmp.ne.s32.totalorder %s556_s17, %s552_s16 }
   0x6   : > { %p111_p1 = scmp.eq.s32.totalorder %s110_s23, 0  ;;  %p124_p2 = scmp.eq.s32.totalorder %s610_s19, 7 }
   0x7   : > { %p129_p3 = scmp.ne.s32.totalorder %s552_s16, %s548_s15  ;;  %p130_p4 = scmp.eq.s32.totalorder %s427_s20, 7 }
   0x8   : > { %s625_s24 = scalar_select %p111_p1, %s556_s17, %s113_s22  }
   0x9   : > { %p627_p5 = por %p124_p2, %p123_p0  ;;  %p631_p6 = por %p130_p4, %p129_p3 }
   0xa   : > { %p430_p7 = scmp.ge.s32.totalorder %s560_s18, 1  ;;  %p165_p8 = scmp.lt.s32.totalorder %s560_s18, 9 }
   0xc   : > { %p166_p9 = pnand %p430_p7, %p165_p8 }
   0xd   : > { %p191_p10 = scmp.lt.s32.totalorder (!%p166_p9), %s610_s19, 7  ;;  %s188_s29 = sand.u32 (!%p166_p9), 1, %s552_s16  }
   0xe   : > { %169 = sbr.rel (%p166_p9) target bundleno = 824 (0x338), region = 36  ;;  %s431_s30 = sshll.u32 (!%p166_p9), %s188_s29, 4 }
   0xf   : > { %s190_s9 = scalar_lea.vmem (!%p166_p9), [#allocation2], %s431_s30  ;;  %s518_s22 = scalar_lea.hbm (!%p166_p9), %s707_s4, 128 }
  0x10   : > { %s362_s10 = sshll.u32 (!%p166_p9), %s190_s9, 4  ;;  %s363_s10 = int_to_ptr.vmem [resolvable:$true] %s362_s10 }
  0x13   : > { %s192_s27 = scalar_select %p191_p10, %s610_s19, 7  ;;  %v196_v2 = vld [vmem:[%s703_s0] sm:$0xff]  ;;  %vm200_vm0 = vcmask 130048   ;;  %v197_v3 = vld [vmem:[%s703_s0 + $0x8] sm:$0xff]  ;;  %v266_v5 = vld [vmem:[%s706_s3 + $0x18] sm:$0xff]  ;;  %vm231_vm1 = vcmask 64512   ;;  %v320_v17 = vlaneseq }
  0x14   : > { %v230_v4 = vld [vmem:[%s705_s2] sm:$0xff]  ;;  %v265_v6 = vld [vmem:[%s706_s3 + $0x10] sm:$0xff]  ;;  %286 = vmatpush.msra.mxu2 %v266_v5  ;;  %v264_v9 = vld [vmem:[%s706_s3 + $0x8] sm:$0xff]  ;;  %vm267_vm2 = vcmask 261120  }
  0x15   : > { %s447_s28 = sshll.u32 %s192_s27, 4  ;;  %253 = vmatpush.msra.mxu1 %v230_v4  ;;  %v263_v10 = vld [vmem:[%s706_s3] sm:$0xff]  ;;  %v321_v18 = vand.u32 127, %v320_v17 }
  0x16   : > { %s195_s5 = scalar_lea.vmem %s704_s1, %s447_s28  ;;  %287 = vmatpush.msra.mxu2 %v265_v6 }
  0x17   : > { %v199_v0 = vld [vmem:[%s195_s5 + $0x8] sm:$0xff]  ;;  %v198_v1 = vld [vmem:[%s195_s5] sm:$0xff]  ;;  %vm322_vm3 = vcmp.lt.s32.totalorder %v321_v18, 4  ;;  %s448_s5 = sshll.u32 %s610_s19, 4  ;;  %s350_s19 = scalar_lea.sflag [#allocation3], %s188_s29 }
  0x18   : > { %221 = vmatpush.msra.mxu0 %v199_v0  ;;  %288 = vmatpush.msra.mxu2 %v264_v9  ;;  %s361_s8 = scalar_lea.hbm %s707_s4, %s448_s5 }
  0x19   : > { %s364_s11 = sshll.u32 %s361_s8, 4  ;;  %s365_s11 = int_to_ptr.hbm [resolvable:$true] %s364_s11 }
  0x1a   : > { %222 = vmatpush.msra.mxu0 %v198_v1  ;;  %289 = vmatpush.msra.mxu2 %v263_v10  ;;  %s512_s12 = sshra.s32 %s365_s11, 4  ;;  %s513_s12 = int_to_ptr.hbm [resolvable:$true] %s512_s12 }
  0x1b   : > { %434 = vmatmul.msk.f32.vlgmr.msra.gmra.mxu0 %vm200_vm0, %v196_v2  ;;  %s514_s13 = scalar_lea.hbm %s513_s12, 16  ;;  %p519_p0 = scmp.lt.s32.totalorder %s513_s12, %s707_s4 }
  0x1c   : > { %p515_p11 = scmp.ne.s32.totalorder %s513_s12, %s514_s13  ;;  %p520_p1 = scmp.lt.s32.totalorder %s518_s22, %s514_s13 }
  0x1e   : > { %p516_p12 = pnand %p515_p11, %p627_p5  ;;  %p521_p2 = por %p520_p1, %p519_p0 }
  0x20   : > { %p517_p13 = pneg %p516_p12 }
  0x22   : > { %p522_p3 = pnand %p521_p2, %p517_p13 }
  0x23   : > { %435 = vmatmul.msk.f32.gmra.mxu0 %vm200_vm0, %v197_v3 }
  0x98   : > { %v224_v7 = vpop.f32.mrf.mxu0 }
  0x99   : > { %436 = vmatmul.msk.f32.vlgmr.msra.gmra.mxu1 %vm231_vm1, %v224_v7 }
  0xa0   : > { %v227_v8 = vpop.f32.mrf.mxu0 }
  0xa1   : > { %437 = vmatmul.msk.f32.gmra.mxu1 %vm231_vm1, %v227_v8 }
 0x116   : > { %v255_v11 = vpop.f32.mrf.mxu1 }
 0x117   : > { %v261_v12 = vmax.f32 %v255_v11, 0.0 }
 0x119   : > { %438 = vmatmul.msk.f32.vlgmr.msra.gmra.mxu2 %vm267_vm2, %v261_v12 }
 0x11e   : > { %v258_v13 = vpop.f32.mrf.mxu1 }
 0x11f   : > { %v262_v14 = vmax.f32 %v258_v13, 0.0 }
 0x121   : > { %439 = vmatmul.msk.f32.gmra.mxu2 %vm267_vm2, %v262_v14 }
 0x19c   : > { %v291_v15 = vpop.f32.mrf.mxu2 }
 0x1a4   : > { %v294_v16 = vpop.f32.mrf.mxu2 }
 0x1a5   : > { %311 = vmatpush.msra.mxu3 %v294_v16 }
 0x1a7   : > { %312 = vmatpush.msra.mxu3 %v291_v15 }
 0x1a8   : > { %440 = vmatmul.msk.f32.vlgmr.msra.gmra.mxu3 %vm200_vm0, %v196_v2 }
 0x1b0   : > { %441 = vmatmul.msk.f32.gmra.mxu3 %vm200_vm0, %v197_v3 }
 0x22b   : > { %v314_v19 = vpop.f32.mrf.mxu3 }
 0x22c   : > { %v323_v20 = vsel %vm322_vm3, %v314_v19, -inf }
 0x22d   : > { %325 = vmax.xlane.f32.xlu0 %v323_v20 }
 0x233   : > { %v317_v21 = vpop.f32.mrf.mxu3 }
 0x234   : > { %v324_v22 = vsel %vm322_vm3, %v317_v21, -inf }
 0x235   : > { %327 = vmax.xlane.f32.xlu0 %v324_v22 }
 0x2a0   : > { %v326_v23 = vpop.xlane.xlu0 %325 }
 0x2a1   : > { %v329_v24 = vsub.f32 %v323_v20, %v326_v23 }
 0x2a3   : > { %v331_v25 = vmul.f32 1.442695, %v329_v24 }
 0x2a5   : > { %490 = vpow2.f32 %v331_v25 }
 0x2a8   : > { %v328_v26 = vpop.xlane.xlu0 %327 }
 0x2a9   : > { %v330_v27 = vsub.f32 %v324_v22, %v328_v26 }
 0x2ab   : > { %v491_v28 = vpop.eup %490  ;;  %v333_v29 = vmul.f32 1.442695, %v330_v27 }
 0x2ac   : > { %335 = vadd.xlane.f32.xlu1 %v491_v28 }
 0x2ad   : > { %492 = vpow2.f32 %v333_v29 }
 0x2b3   : > { %v493_v30 = vpop.eup %492 }
 0x2b4   : > { %337 = vadd.xlane.f32.xlu1 %v493_v30 }
 0x31f   : > { %v336_v31 = vpop.xlane.xlu1 %335 }
 0x320   : > { %494 = vlog2.f32 %v336_v31 }
 0x326   : > { %v495_v32 = vpop.eup %494 }
 0x327   : > { %v340_v33 = vmul.f32 0.6931472, %v495_v32  ;;  %v338_v34 = vpop.xlane.xlu1 %337 }
 0x328   : > { %496 = vlog2.f32 %v338_v34 }
 0x329   : > { %v343_v35 = vsub.f32 %v329_v24, %v340_v33 }
 0x32b   : > { %v345_v36 = vsel %vm322_vm3, %v343_v35, 0.0 }
 0x32c   : > { %347 = vst [vmem:[%s190_s9] sm:$0xff] %v345_v36 }
 0x32e   : > { %v497_v37 = vpop.eup %496 }
 0x32f   : > { %v342_v38 = vmul.f32 0.6931472, %v497_v37 }
 0x331   : > { %v344_v39 = vsub.f32 %v330_v27, %v342_v38 }
 0x333   : > { %v346_v40 = vsel %vm322_vm3, %v344_v39, 0.0 }
 0x334   : > { %348 = vst [vmem:[%s190_s9 + $0x8] sm:$0xff] %v346_v40 }
 0x335   : > { %525 = shalt.err (!%p522_p3)
}
 0x336   : > { %s562_s28 = smov 128   ;;  %s563_s29 = smov 8  }
 0x337   : > { %449 = dma.vmem_to_hbm [thread:$0]  (%p627_p5), %s363_s10, 256, %s365_s11, %s350_s19, %s562_s28, %s562_s28, %s563_s29  }
 0x338 PF: > { %p455_p4 = scmp.ge.s32.totalorder %s560_s18, 2  ;;  %s379_s30 = sand.u32 1, %s548_s15  }
 0x339   : > { %s380_s5 = scalar_lea.sflag [#allocation3], %s379_s30 }
 0x33a   : > { %p452_p7 = pnand %p455_p4, %p631_p6 }
 0x33c   : > { %p453_p8 = pneg %p452_p7 }
 0x33e   : > { %543 = dma.done.wait (%p453_p8), %s380_s5, 256  }
 0x33f   : > { %545 = vsyncadd (%p453_p8), %s380_s5, 4294967040  ;;  %p14_p9 = scmp.ge.s32.totalorder %s614_s21, 10   ;;  %s710_s15 = smov %s552_s16 }
 0x340   : > { %s711_s16 = smov %s556_s17  ;;  %s712_s17 = smov %s625_s24 }
 0x341   : > { %s713_s18 = smov %s614_s21  ;;  %16 = sbr.rel (!%p14_p9) target bundleno = 3 (0x3), region = 71 }
 0x346   :  { %386 = vsyncpa [#allocation3], 1 }
 0x347   :  { %388 = vsyncpa [#allocation3 + $0x1], 1 }

</bundles_post_ra>
